<compile_context>
chip_gen: v6e
topology: v6e:2x2x1
jax: 0.10.0
libtpu: 0.0.40
codegen_flags: <defaults>
</compile_context>

<pallas_src>
import functools
import math

import jax
import jax.numpy as jnp
from jax.experimental import pallas as pl
from jax.experimental.pallas import tpu as pltpu


def _self_attn_kernel(q_ref, k_ref, mask_ref, out_ref, *, head_dim):
    # q_ref:    (1, 1, TQ, dH)  query rows for this tile (query == key in this module)
    # k_ref:    (1, 1, S,  dH)  full key block, resident across query tiles
    # mask_ref: (1, 1, S)       per-batch binary mask row
    # out_ref:  (1, 1, TQ, S)   attention probabilities for this query tile
    scale = 1.0 / math.sqrt(head_dim)

    # Fold the softmax scale into q (TQ*dH mults, not TQ*S), then feed the MXU in bf16.
    q = (q_ref[0, 0] * scale).astype(jnp.bfloat16)      # (TQ, dH)
    k = k_ref[0, 0].astype(jnp.bfloat16)                # (S, dH)

    # scores[i, j] = sum_d q[i, d] * k[j, d]; contraction on last dims -> no transpose.
    scores = jax.lax.dot_general(
        q, k, (((1,), (1,)), ((), ())), preferred_element_type=jnp.float32
    )                                                   # (TQ, S) f32

    # additive mask: (1 - mask) * -10000, broadcast over query rows
    add_mask = (1.0 - mask_ref[0, 0]) * (-10000.0)      # (S,)
    scores = scores + add_mask[None, :]

    # numerically stable softmax along the key axis; exact normalization so that
    # each output row sums to 1 within f32 rounding.
    m = jnp.max(scores, axis=-1, keepdims=True)
    e = jnp.exp(scores - m)
    denom = jnp.sum(e, axis=-1, keepdims=True)
    inv = 1.0 / denom                                   # one exact divide per row
    probs = e * inv

    out_ref[0, 0] = probs.astype(out_ref.dtype)


def bert_self_attention(hidden_states, attention_mask, num_attention_heads):
    """hidden_states: [B, S, H] f32, attention_mask: [B, S] -> probs [B, nH, S, S] f32."""
    B, S, H = hidden_states.shape
    assert H % num_attention_heads == 0
    dH = H // num_attention_heads

    # transpose_for_scores: [B, S, H] -> [B, nH, S, dH]   (XLA glue; tiny vs S^2 output)
    q = hidden_states.reshape(B, S, num_attention_heads, dH).transpose(0, 2, 1, 3)
    q = q.astype(jnp.float32)
    # (B, 1, S) so the mask block's trailing two dims equal the full array dims.
    mask = attention_mask.astype(jnp.float32)[:, None, :]

    # Query-dim tiling: whole S for short sequences, 256-row tiles for long ones so the
    # in-flight blocks (query tile + resident key + output tile, double-buffered) stay
    # well inside the smallest VMEM budgets (v7x / v5e).
    if S <= 512 or S % 256 != 0:
        TQ = S
    else:
        TQ = 256
    n_q = S // TQ

    kernel = functools.partial(_self_attn_kernel, head_dim=dH)

    return pl.pallas_call(
        kernel,
        out_shape=jax.ShapeDtypeStruct((B, num_attention_heads, S, S), jnp.float32),
        grid_spec=pltpu.PrefetchScalarGridSpec(
            num_scalar_prefetch=0,
            grid=(B, num_attention_heads, n_q),
            in_specs=[
                # query tile for this (b, h, qi)
                pl.BlockSpec((1, 1, TQ, dH), lambda b, h, qi: (b, h, qi, 0)),
                # full key block; index_map ignores qi so it stays resident across q tiles
                pl.BlockSpec((1, 1, S, dH), lambda b, h, qi: (b, h, 0, 0)),
                # per-batch attention mask row
                pl.BlockSpec((1, 1, S), lambda b, h, qi: (b, 0, 0)),
            ],
            out_specs=pl.BlockSpec((1, 1, TQ, S), lambda b, h, qi: (b, h, qi, 0)),
        ),
        compiler_params=pltpu.CompilerParams(
            dimension_semantics=("parallel", "parallel", "parallel"),
        ),
    )(q, q, mask)


def _reference(hidden_states, attention_mask, num_attention_heads):
    B, S, H = hidden_states.shape
    dH = H // num_attention_heads
    q = hidden_states.reshape(B, S, num_attention_heads, dH).transpose(0, 2, 1, 3)
    scores = jnp.einsum("bhqd,bhkd->bhqk", q, q) / math.sqrt(dH)
    mask = (1.0 - attention_mask)[:, None, None, :] * -10000.0
    scores = scores + mask
    return jax.nn.softmax(scores, axis=-1)


if __name__ == "__main__":
    B, S, H, NH = 2, 8, 32, 4
    key = jax.random.PRNGKey(0)
    k1, k2 = jax.random.split(key)
    hidden_states = jax.random.normal(k1, (B, S, H), dtype=jnp.float32)
    # binary attention mask (1 = keep, 0 = masked), deterministic
    attention_mask = (jax.random.uniform(k2, (B, S)) > 0.2).astype(jnp.float32)

    probs = bert_self_attention(hidden_states, attention_mask, NH)
    jax.block_until_ready(probs)

    ref = _reference(hidden_states, attention_mask, NH)
    assert probs.shape == (B, NH, S, S)
    # bf16 MXU inputs loosen the element-wise tolerance vs. pure f32.
    assert jnp.allclose(probs, ref, atol=3e-2, rtol=3e-2)
    # rows of the probability matrix must sum to 1 (exact f32 normalization in-kernel)
    assert jnp.allclose(jnp.sum(probs, axis=-1), 1.0, atol=1e-3)

    print("KERNEL_OK")
</pallas_src>

<mosaic_0001>
module attributes {stable_mosaic.version = 11 : i64} {
  func.func @_self_attn_kernel(%arg0: i32, %arg1: i32, %arg2: i32, %arg3: memref<1x1x8x8xf32, #tpu.memory_space<vmem>>, %arg4: memref<1x1x8x8xf32, #tpu.memory_space<vmem>>, %arg5: memref<1x1x8xf32, #tpu.memory_space<vmem>>, %arg6: memref<1x1x8x8xf32, #tpu.memory_space<vmem>>) attributes {dimension_semantics = [#tpu.dimension_semantics<parallel>, #tpu.dimension_semantics<parallel>, #tpu.dimension_semantics<parallel>], iteration_bounds = array<i64: 2, 4, 1>, scalar_prefetch = 0 : i64, scratch_operands = 0 : i64, tpu.core_type = #tpu.core_type<tc>, window_params = [{transform_indices = @transform_0, window_bounds = array<i64: 1, 1, 8, 8>}, {transform_indices = @transform_1, window_bounds = array<i64: 1, 1, 8, 8>}, {transform_indices = @transform_2, window_bounds = array<i64: 1, 1, 8>}, {transform_indices = @transform_3, window_bounds = array<i64: 1, 1, 8, 8>}]} {
    %c0 = arith.constant 0 : index
    %c0_0 = arith.constant 0 : index
    %c0_1 = arith.constant 0 : index
    %c0_2 = arith.constant 0 : index
    %0 = vector.load %arg3[%c0, %c0_0, %c0_1, %c0_2] : memref<1x1x8x8xf32, #tpu.memory_space<vmem>>, vector<1x1x8x8xf32>
    %1 = vector.shape_cast %0 : vector<1x1x8x8xf32> to vector<8x8xf32>
    %cst = arith.constant 0.353553385 : f32
    %2 = vector.broadcast %cst : f32 to vector<8x8xf32>
    %3 = arith.mulf %1, %2 : vector<8x8xf32>
    %4 = arith.truncf %3 : vector<8x8xf32> to vector<8x8xbf16>
    %c0_3 = arith.constant 0 : index
    %c0_4 = arith.constant 0 : index
    %c0_5 = arith.constant 0 : index
    %c0_6 = arith.constant 0 : index
    %5 = vector.load %arg4[%c0_3, %c0_4, %c0_5, %c0_6] : memref<1x1x8x8xf32, #tpu.memory_space<vmem>>, vector<1x1x8x8xf32>
    %6 = vector.shape_cast %5 : vector<1x1x8x8xf32> to vector<8x8xf32>
    %7 = arith.truncf %6 : vector<8x8xf32> to vector<8x8xbf16>
    %cst_7 = arith.constant dense<0.000000e+00> : vector<8x8xf32>
    %8 = tpu.matmul %4, %7, %cst_7 {dimension_numbers = #tpu.dot_dimension_numbers<[1], [1], [0], [0], [0, 0, 1, 0], [], []>} : vector<8x8xbf16>, vector<8x8xbf16>, vector<8x8xf32> -> vector<8x8xf32>
    %c0_8 = arith.constant 0 : index
    %c0_9 = arith.constant 0 : index
    %c0_10 = arith.constant 0 : index
    %9 = vector.load %arg5[%c0_8, %c0_9, %c0_10] : memref<1x1x8xf32, #tpu.memory_space<vmem>>, vector<1x1x8xf32>
    %10 = vector.shape_cast %9 : vector<1x1x8xf32> to vector<8xf32>
    %cst_11 = arith.constant 1.000000e+00 : f32
    %11 = vector.broadcast %cst_11 : f32 to vector<8xf32>
    %12 = arith.subf %11, %10 : vector<8xf32>
    %cst_12 = arith.constant -1.000000e+04 : f32
    %13 = vector.broadcast %cst_12 : f32 to vector<8xf32>
    %14 = arith.mulf %12, %13 : vector<8xf32>
    %15 = vector.shape_cast %14 : vector<8xf32> to vector<1x8xf32>
    %16 = vector.broadcast %15 : vector<1x8xf32> to vector<8x8xf32>
    %17 = arith.addf %8, %16 : vector<8x8xf32>
    %cst_13 = arith.constant dense<0xFF800000> : vector<8xf32>
    %18 = vector.multi_reduction <maximumf>, %17, %cst_13 [1] : vector<8x8xf32> to vector<8xf32>
    %19 = vector.shape_cast %18 : vector<8xf32> to vector<8x1xf32>
    %20 = vector.broadcast %19 : vector<8x1xf32> to vector<8x8xf32>
    %21 = arith.subf %17, %20 : vector<8x8xf32>
    %22 = math.exp %21 : vector<8x8xf32>
    %cst_14 = arith.constant dense<0.000000e+00> : vector<8xf32>
    %23 = vector.multi_reduction <add>, %22, %cst_14 [1] : vector<8x8xf32> to vector<8xf32>
    %24 = vector.shape_cast %23 : vector<8xf32> to vector<8x1xf32>
    %cst_15 = arith.constant 1.000000e+00 : f32
    %25 = vector.broadcast %cst_15 : f32 to vector<8x1xf32>
    %26 = arith.divf %25, %24 : vector<8x1xf32>
    %27 = vector.broadcast %26 : vector<8x1xf32> to vector<8x8xf32>
    %28 = arith.mulf %22, %27 : vector<8x8xf32>
    %c0_16 = arith.constant 0 : index
    %c0_17 = arith.constant 0 : index
    %c0_18 = arith.constant 0 : index
    %c0_19 = arith.constant 0 : index
    %29 = vector.load %arg6[%c0_16, %c0_17, %c0_18, %c0_19] : memref<1x1x8x8xf32, #tpu.memory_space<vmem>>, vector<1x1x8x8xf32>
    %30 = vector.shape_cast %29 : vector<1x1x8x8xf32> to vector<8x8xf32>
    %31 = vector.shape_cast %28 : vector<8x8xf32> to vector<1x1x8x8xf32>
    tpu.vector_store %arg6[%c0_16, %c0_17, %c0_18, %c0_19], %31 {strides = array<i32>} : memref<1x1x8x8xf32, #tpu.memory_space<vmem>>, vector<1x1x8x8xf32>,
    return
  }
  func.func @transform_0(%arg0: i32, %arg1: i32, %arg2: i32) -> (i32, i32, i32, i32) {
    %c0_i32 = arith.constant 0 : i32
    %c0_i32_0 = arith.constant 0 : i32
    return %arg0, %arg1, %arg2, %c0_i32 : i32, i32, i32, i32
  }
  func.func @transform_1(%arg0: i32, %arg1: i32, %arg2: i32) -> (i32, i32, i32, i32) {
    %c0_i32 = arith.constant 0 : i32
    %c0_i32_0 = arith.constant 0 : i32
    %c0_i32_1 = arith.constant 0 : i32
    return %arg0, %arg1, %c0_i32, %c0_i32_0 : i32, i32, i32, i32
  }
  func.func @transform_2(%arg0: i32, %arg1: i32, %arg2: i32) -> (i32, i32, i32) {
    %c0_i32 = arith.constant 0 : i32
    %c0_i32_0 = arith.constant 0 : i32
    %c0_i32_1 = arith.constant 0 : i32
    return %arg0, %c0_i32, %c0_i32_0 : i32, i32, i32
  }
  func.func @transform_3(%arg0: i32, %arg1: i32, %arg2: i32) -> (i32, i32, i32, i32) {
    %c0_i32 = arith.constant 0 : i32
    %c0_i32_0 = arith.constant 0 : i32
    return %arg0, %arg1, %arg2, %c0_i32 : i32, i32, i32, i32
  }
}

</mosaic_0001>

<bundles_post_ra>
// kernel: tpu_custom_call.1
= control target key start
LH: loop header
LB: loop body
LE: loop exit
PB: predicated region body
PF: predicated region fallthrough
CT: control target
= control target key end

     0   :  { %s989_s0 = inlined_call_operand.hbm [shape: f32[2,4,8,8], index: 0, kind: input, shape index: {}]   ;;  %s990_s1 = inlined_call_operand.hbm [shape: f32[2,4,8,8], index: 1, kind: input, shape index: {}]   ;;  %s991_s2 = inlined_call_operand.vmem [shape: f32[2,1,8], index: 2, kind: input, shape index: {}]   ;;  %s992_s3 = inlined_call_operand.hbm [shape: f32[2,4,8,8], index: 3, kind: output, shape index: {}]  }
   0x1   :  { %994 = sst [smem:[#allocation12_spill]] %s989_s0 }
   0x2   :  { %8 = vsyncpa [#allocation3], 0 }
   0x3   :  { %10 = vsyncpa [#allocation3 + $0x1], 0 }
   0x4   :  { %11 = vsyncpa [#allocation6], 0 }
   0x5   :  { %13 = vsyncpa [#allocation6 + $0x1], 0 }
   0x6   :  { %14 = vsyncpa [#allocation4], 0 }
   0x7   :  { %16 = vsyncpa [#allocation4 + $0x1], 0  ;;  %s787_s12 = smov 0   ;;  %s789_s13 = smov 0  }
   0x8   :  { %s791_s14 = smov 0   ;;  %s793_s15 = smov 0  }
   0x9   :  { %s795_s16 = smov 0   ;;  %s797_s17 = smov 0  }
   0xa   :  { %s799_s18 = smov 0   ;;  %s801_s19 = smov 0  }
   0xb LB: > { %s487_s20 = sadd.s32 4294967295, %s760_s19   ;;  %s488_s21 = sadd.s32 4294967294, %s760_s19   ;;  %s760_s19 = sphi %s801_s19, %s22_s19   ;;  %s756_s18 = sphi %s799_s18, %s1010_s18   ;;  %s752_s17 = sphi %s797_s17, %s1009_s17   ;;  %s748_s16 = sphi %s795_s16, %s1008_s16   ;;  %s744_s15 = sphi %s793_s15, %s1007_s15   ;;  %s740_s14 = sphi %s791_s14, %s1006_s14   ;;  %s736_s13 = sphi %s789_s13, %s1005_s13   ;;  %s732_s12 = sphi %s787_s12, %s1004_s12  }
   0xc   : > { %s37_s22 = sadd.s32 1, %s752_s17  ;;  %s41_s23 = sadd.s32 1, %s756_s18 }
   0xd   : > { %p39_p0 = scmp.ge.s32.totalorder %s37_s22, 4  ;;  %s52_s24 = sadd.s32 1, %s740_s14 }
   0xe   : > { %p59_p1 = scmp.ne.s32.totalorder %s740_s14, %s736_s13  ;;  %p60_p2 = scmp.eq.s32.totalorder %s760_s19, 0 }
   0xf   : > { %s1012_s22 = smov (%p39_p0, %s37_s22), 0  ;;  %s1014_s23 = smov (!%p39_p0, %s41_s23), %s756_s18 }
  0x10   : > { %s46_s25 = ssub.s32 %s752_s17, %s1012_s22  ;;  %p840_p3 = por %p60_p2, %p59_p1 }
  0x11   : > { %p43_p4 = scmp.ge.s32.totalorder %s1014_s23, 2  ;;  %p65_p5 = scmp.ne.s32.totalorder %s736_s13, %s732_s12 }
  0x12   : > { %p66_p6 = scmp.eq.s32.totalorder %s487_s20, 0  ;;  %p147_p7 = scmp.eq.s32.totalorder %s487_s20, 7 }
  0x13   : > { %s1016_s23 = smov (%p43_p4, %s1014_s23), 0  ;;  %p153_p10 = scmp.eq.s32.totalorder %s488_s21, 7 }
  0x14   : > { %996 = sst [smem:[#allocation11_spill]] %s1016_s23  ;;  %p848_p8 = por %p66_p6, %p65_p5 }
  0x15   : > { %p852_p9 = por %p147_p7, %p59_p1  ;;  %s45_s29 = ssub.s32 %s756_s18, %s1016_s23 }
  0x16   : > { %s47_s30 = sor.u32 %s46_s25, %s45_s29  ;;  %p858_p12 = por %p153_p10, %p65_p5 }
  0x17   : > { %p50_p11 = scmp.eq.s32.totalorder %s47_s30, 0  ;;  %p532_p13 = scmp.lt.s32.totalorder %s760_s19, 8 }
  0x18   : > { %s864_s5 = sand.u32 1, %s740_s14   ;;  %s492_s8 = sshll.u32 %s756_s18, 2 }
  0x19   : > { %s867_s6 = scalar_select %p50_p11, %s740_s14, %s52_s24  }
  0x1a   : > { %s491_s7 = sshll.u32 %s864_s5, 3  ;;  %s183_s9 = sadd.s32 %s752_s17, %s492_s8 }
  0x1b   : > { %s177_s10 = scalar_lea.vmem [#allocation2], %s491_s7  ;;  %s493_s20 = sshll.u32 %s183_s9, 7 }
  0x1c   : > { %s187_s11 = sshll.u32 %s177_s10, 4  ;;  %s1000_s0 = sld [smem:[#allocation12_spill]]  ;;  %s188_s11 = int_to_ptr.vmem [resolvable:$true] %s187_s11 }
  0x1d   : > { %p879_p0 = pnand %p532_p13, %p840_p3  ;;  %p497_p1 = scmp.ge.s32.totalorder %s760_s19, 1 }
  0x1e   : > { %p218_p2 = scmp.lt.s32.totalorder %s760_s19, 9  ;;  %s174_s24 = scalar_lea.sflag [#allocation3], %s864_s5 }
  0x1f   : > { %p606_p4 = pneg %p879_p0  ;;  %s617_s8 = scalar_lea.vmem %s188_s11, 128 }
  0x20   : > { %p618_p5 = scmp.ne.s32.totalorder %s188_s11, %s617_s8  ;;  %s762_s9 = smov [#allocation2]  }
  0x21   : > { %s622_s10 = sshll.u32 %s762_s9, 4  ;;  %s623_s10 = int_to_ptr.vmem [resolvable:$false] %s622_s10 }
  0x22   : > { %s185_s29 = scalar_lea.hbm %s1000_s0, %s493_s20  ;;  %p620_p6 = pnand %p618_p5, %p606_p4 }
  0x23   : > { %s624_s26 = scalar_lea.vmem %s623_s10, 256  ;;  %p625_p3 = scmp.lt.s32.totalorder %s188_s11, %s623_s10 }
  0x24   : > { %p621_p7 = pneg %p620_p6  ;;  %p626_p10 = scmp.lt.s32.totalorder %s624_s26, %s617_s8 }
  0x26   : > { %p627_p11 = por %p626_p10, %p625_p3 }
  0x28   : > { %p628_p13 = pnand %p627_p11, %p621_p7 }
  0x2a   : > { %631 = shalt.err (!%p628_p13)
}
  0x2b   : > { %524 = dma.hbm_to_vmem [thread:$0]  (!%p879_p0), %s185_s29, 128, %s188_s11, %s174_s24  }
  0x2c   : > { %p897_p5 = pnand %p497_p1, %p218_p2  ;;  %s205_s8 = scalar_lea.hbm %s990_s1, %s493_s20 }
  0x2d   : > { %s198_s10 = scalar_lea.vmem [#allocation5], %s491_s7  ;;  %s195_s0 = scalar_lea.sflag [#allocation6], %s864_s5 }
  0x2e   : > { %s207_s26 = sshll.u32 %s198_s10, 4  ;;  %s763_s11 = smov [#allocation5]   ;;  %s208_s26 = int_to_ptr.vmem [resolvable:$true] %s207_s26 }
  0x2f   : > { %s645_s23 = scalar_lea.vmem %s208_s26, 128  ;;  %s650_s29 = sshll.u32 %s763_s11, 4  ;;  %s651_s29 = int_to_ptr.vmem [resolvable:$false] %s650_s29 }
  0x30   : > { %p646_p6 = scmp.ne.s32.totalorder %s208_s26, %s645_s23  ;;  %s652_s24 = scalar_lea.vmem %s651_s29, 256 }
  0x31   : > { %p653_p1 = scmp.lt.s32.totalorder %s208_s26, %s651_s29  ;;  %p654_p2 = scmp.lt.s32.totalorder %s652_s24, %s645_s23 }
  0x32   : > { %p648_p7 = pnand %p646_p6, %p606_p4 }
  0x33   : > { %p655_p10 = por %p654_p2, %p653_p1 }
  0x34   : > { %p649_p3 = pneg %p648_p7 }
  0x36   : > { %p656_p11 = pnand %p655_p10, %p649_p3 }
  0x38   : > { %659 = shalt.err (!%p656_p11)
}
  0x39   : > { %527 = dma.hbm_to_vmem [thread:$0]  (!%p879_p0), %s205_s8, 128, %s208_s26, %s195_s0  }
  0x3a   : > { %222 = sbr.rel (%p897_p5) target bundleno = 597 (0x255), region = 32  ;;  %s915_s5 = sand.u32 (!%p897_p5), 1, %s736_s13  }
  0x3b   : > { %s918_s7 = sshll.u32 (!%p897_p5), %s915_s5, 3  ;;  %s225_s20 = scalar_lea.sflag (!%p897_p5), [#allocation3], %s915_s5 }
  0x3c   : > { %s228_s23 = scalar_lea.vmem (!%p897_p5), [#allocation2], %s918_s7 }
  0x3f   : > { %719 = dma.done.wait (%p848_p8), %s225_s20, 128  }
  0x40   : > { %721 = vsyncadd (%p848_p8), %s225_s20, 4294967168  ;;  %s234_s0 = scalar_lea.sflag [#allocation6], %s915_s5  ;;  %s237_s30 = scalar_lea.vmem [#allocation5], %s918_s7 }
  0x41   : > { %723 = dma.done.wait (%p848_p8), %s234_s0, 128  }
  0x42   : > { %725 = vsyncadd (%p848_p8), %s234_s0, 4294967168  ;;  %v764_v0 = vmov 0.0   ;;  %vm765_vm0 = vmmov 0   ;;  %v275_v1 = vld [vmem:[%s237_s30] sm:$0xff]  ;;  %vm286_vm1 = vcmask 64512   ;;  %v272_v2 = vld [vmem:[%s228_s23] sm:$0xff]  ;;  %v281_v7 = vlaneseq }
  0x43   : > { %509 = vmatprep.subr.bf16.mxu0 %v764_v0  ;;  %511 = vmatprep.mubr.msk.bf16.mxu0 %vm765_vm0, %v764_v0  ;;  %v276_v3 = vpack.c.bf16 %v275_v1, %v275_v1  ;;  %v273_v5 = vmul.f32 0.35355338, %v272_v2  ;;  %p268_p0 = scmp.lt.s32.totalorder %s748_s16, 1  ;;  %s503_s8 = sshll.u32 %s748_s16, 2 }
  0x44   : > { %v282_v10 = vshrl.u32 %v281_v7, 7  ;;  %s359_s10 = sadd.s32 %s744_s15, %s503_s8  ;;  %s267_s11 = scalar_lea.vmem [#allocation7], %s918_s7 }
  0x45   : > { %v291_v4 = vsel %vm286_vm1, %v276_v3, 0  ;;  %v274_v6 = vpack.c.bf16 %v273_v5, %v273_v5  ;;  %s269_s27 = scalar_select %p268_p0, %s748_s16, 1 }
  0x46   : > { %510 = vmatpush3.bf16.xpose.msra.mxu0 %v291_v4  ;;  %v283_v12 = vsub.s32 0, %v282_v10  ;;  %s504_s26 = sshll.u32 %s359_s10, 7  ;;  %s363_s29 = sshll.u32 %s267_s11, 4  ;;  %s364_s29 = int_to_ptr.vmem [resolvable:$true] %s363_s29 }
  0x47   : > { %s270_s9 = scalar_lea.vmem %s991_s2, %s269_s27  ;;  %s361_s23 = scalar_lea.hbm %s992_s3, %s504_s26 }
  0x48   : > { %v277_v8 = vld [vmem:[%s270_s9] sm:$0x1]  ;;  %s347_s0 = scalar_lea.sflag [#allocation4], %s915_s5  ;;  %s660_s30 = scalar_lea.vmem %s364_s29, 128 }
  0x49   : > { %v278_v9 = vsub.f32 1.0, %v277_v8  ;;  %p661_p8 = scmp.ne.s32.totalorder %s364_s29, %s660_s30  ;;  %s766_s16 = smov [#allocation7]  }
  0x4a   : > { %s664_s15 = sshll.u32 %s766_s16, 4  ;;  %s665_s15 = int_to_ptr.vmem [resolvable:$false] %s664_s15 }
  0x4b   : > { %v279_v11 = vmul.f32 -10000.0, %v278_v9  ;;  %p662_p4 = pnand %p661_p8, %p852_p9  ;;  %s666_s7 = scalar_lea.vmem %s665_s15, 256 }
  0x4c   : > { %p667_p5 = scmp.lt.s32.totalorder %s364_s29, %s665_s15  ;;  %p668_p6 = scmp.lt.s32.totalorder %s666_s7, %s660_s30 }
  0x4d   : > { %512 = vmatmul.mubr.msk.bf16.vlgmr.msra.gmra.mxu0 %vm286_vm1, %v274_v6  ;;  %v284_v13 = vrot.slane %v279_v11, %v283_v12  ;;  %p663_p13 = pneg %p662_p4 }
  0x4e   : > { %p669_p7 = por %p668_p6, %p667_p5 }
  0x50   : > { %p670_p3 = pnand %p669_p7, %p663_p13 }
 0x10d   : > { %v327_v14 = vpop.f32.mrf.mxu0 }
 0x10e   : > { %v328_v15 = vadd.f32 %v327_v14, %v284_v13 }
 0x10f   : > { %v513_v16 = vpop.f32.mrf.mxu0 }
 0x110   : > { %v333_v17 = vsel %vm286_vm1, %v328_v15, -inf }
 0x111   : > { %334 = vmax.xlane.f32.xlu0 %v333_v17  ;;  %v330_v18 = vpop.f32.mrf.mxu0 }
 0x113   : > { %v514_v19 = vpop.f32.mrf.mxu0 }
 0x19a   : > { %v335_v20 = vpop.xlane.xlu0 %334 }
 0x19b   : > { %v336_v21 = vsub.f32 %v328_v15, %v335_v20 }
 0x19d   : > { %v337_v22 = vmul.f32 1.442695, %v336_v21 }
 0x19f   : > { %600 = vpow2.f32 %v337_v22 }
 0x1ac   : > { %v601_v23 = vpop.eup %600 }
 0x1ad   : > { %v339_v24 = vsel %vm286_vm1, %v601_v23, 0.0 }
 0x1ae   : > { %340 = vadd.xlane.f32.xlu0 %v339_v24 }
 0x237   : > { %v341_v25 = vpop.xlane.xlu0 %340 }
 0x238   : > { %602 = vrcp.f32 %v341_v25 }
 0x245   : > { %v603_v26 = vpop.eup %602 }
 0x246   : > { %v344_v27 = vmul.f32 %v603_v26, %v601_v23 }
 0x248   : > { %345 = vst.msk [vmem:[%s267_s11] sm:$0xff] %vm286_vm1, %v344_v27 }
 0x249   : > { %673 = shalt.err (!%p670_p3)
}
 0x24a   : > { %s674_s27 = scalar_lea.hbm %s361_s23, 128  ;;  %s678_s25 = scalar_lea.hbm %s992_s3, 1024 }
 0x24b   : > { %p675_p1 = scmp.ne.s32.totalorder %s361_s23, %s674_s27  ;;  %p679_p11 = scmp.lt.s32.totalorder %s361_s23, %s992_s3 }
 0x24c   : > { %p680_p0 = scmp.lt.s32.totalorder %s678_s25, %s674_s27 }
 0x24d   : > { %p676_p2 = pnand %p675_p1, %p852_p9 }
 0x24e   : > { %p681_p8 = por %p680_p0, %p679_p11 }
 0x24f   : > { %p677_p10 = pneg %p676_p2 }
 0x251   : > { %p682_p4 = pnand %p681_p8, %p677_p10 }
 0x253   : > { %685 = shalt.err (!%p682_p4)
}
 0x254   : > { %519 = dma.vmem_to_hbm [thread:$0]  (%p852_p9), %s364_s29, 128, %s361_s23, %s347_s0  }
 0x255 PF: > { %p533_p13 = scmp.ge.s32.totalorder %s760_s19, 2  ;;  %s375_s10 = sand.u32 1, %s732_s12  }
 0x256   : > { %s376_s26 = scalar_lea.sflag [#allocation4], %s375_s10 }
 0x257   : > { %p529_p5 = pnand %p533_p13, %p858_p12 }
 0x259   : > { %p530_p6 = pneg %p529_p5 }
 0x25b   : > { %727 = dma.done.wait (%p530_p6), %s376_s26, 128  }
 0x25c   : > { %729 = vsyncadd (%p530_p6), %s376_s26, 4294967168  ;;  %s22_s19 = sadd.s32 1, %s760_s19   ;;  %s1003_s28 = sld [smem:[#allocation11_spill]] }
 0x25d   : > { %p19_p7 = scmp.ge.s32.totalorder %s22_s19, 10   ;;  %s1004_s12 = smov %s736_s13 }
 0x25e   : > { %s1005_s13 = smov %s740_s14  ;;  %s1006_s14 = smov %s867_s6 }
 0x25f   : > { %s1007_s15 = smov %s752_s17  ;;  %s1008_s16 = smov %s756_s18 }
 0x260   : > { %s1009_s17 = smov %s1012_s22  ;;  %21 = sbr.rel (!%p19_p7) target bundleno = 11 (0xb), region = 93 }
 0x262   : > { %s1010_s18 = smov %s1003_s28 }
 0x265   :  { %381 = vsyncpa [#allocation3], 1 }
 0x266   :  { %383 = vsyncpa [#allocation3 + $0x1], 1 }
 0x267   :  { %384 = vsyncpa [#allocation6], 1 }
 0x268   :  { %386 = vsyncpa [#allocation6 + $0x1], 1 }
 0x269   :  { %387 = vsyncpa [#allocation4], 1 }
 0x26a   :  { %389 = vsyncpa [#allocation4 + $0x1], 1 }

</bundles_post_ra>
